<compile_context>
chip_gen: v7x
topology: tpu7x:2x2x1
jax: 0.10.0
libtpu: 0.0.40
codegen_flags: <defaults>
</compile_context>

<pallas_src>
import functools

import jax
import jax.numpy as jnp
from jax.experimental import pallas as pl
from jax.experimental.pallas import tpu as pltpu


LANE = 128     # hidden-layer output dims are padded to a multiple of this
SUBLANE = 8    # batch tiles (when != full batch) must be a multiple of this


def _round_up(n, m):
    return (n + m - 1) // m * m


def _make_mlp_kernel(num_layers):
    """Fused MLP: (matmul + bias [+ tanh]) chain; no tanh on the last layer."""

    def kernel(x_ref, *refs):
        # refs = (w0, b0, w1, b1, ..., w_{L-1}, b_{L-1}, out_ref)
        out_ref = refs[-1]
        h = x_ref[...].astype(jnp.float32)
        for i in range(num_layers):            # static unroll: visible to LLO
            w = refs[2 * i][...]                # (in_pad, out_pad), bf16
            b = refs[2 * i + 1][...]            # (1, out_pad), f32
            h = jnp.dot(h.astype(jnp.bfloat16), w,
                        preferred_element_type=jnp.float32) + b
            if i < num_layers - 1:              # Sequential(*layers[:-1]) drops last Tanh
                h = jnp.tanh(h)
        out_ref[...] = h.astype(out_ref.dtype)

    return kernel


def prepare_params(weights, biases, matmul_dtype=jnp.bfloat16):
    """One-time layout prep (call OUTSIDE the jitted forward path).

    weights[i]: (out_i, in_i)  -- PyTorch nn.Linear convention
    biases[i] : (out_i,)

    Returns (w0_t, b0, w1_t, b1, ...): each w_t is (in_pad, out_pad) in
    `matmul_dtype`, pre-transposed so the kernel computes h @ W_t + b
    (== torch's x @ W.T + b); each bias is (1, out_pad) f32.

    Hidden-layer out dims are zero-padded to multiples of 128 (lane-dense
    intermediates). INVARIANT: padded weight rows/cols and bias entries are
    exactly 0, so padded channels stay 0 through bias + tanh and contribute
    nothing downstream. The LAST layer's out dim is left unpadded so the
    kernel writes the true (batch, out_dim) output with no post-slice.
    """
    num_layers = len(weights)
    flat = []
    prev_out_pad = None
    for i, (w, b) in enumerate(zip(weights, biases)):
        w = jnp.asarray(w)
        b = jnp.asarray(b)
        out_dim, in_dim = w.shape
        in_pad = in_dim if prev_out_pad is None else prev_out_pad
        is_last = i == num_layers - 1
        out_pad = out_dim if is_last else _round_up(out_dim, LANE)
        w_t = jnp.zeros((in_pad, out_pad), dtype=jnp.float32)
        w_t = w_t.at[:in_dim, :out_dim].set(w.T.astype(jnp.float32))
        b_p = jnp.zeros((1, out_pad), dtype=jnp.float32)
        b_p = b_p.at[:, :out_dim].set(b.astype(jnp.float32))
        flat.append(w_t.astype(matmul_dtype))
        flat.append(b_p)
        prev_out_pad = out_pad
    return tuple(flat)


def _pick_batch_tile(batch, row_bytes, block_batch):
    """Choose (tile_rows, grid_steps).

    Single grid step whenever the whole batch's working set fits the VMEM
    budget (no pipeline to expose, no partial blocks); otherwise ~1024-row
    tiles, capped by a generation-aware VMEM budget (v7x has 64 MiB physical /
    32 MiB scoped default vs 128 MiB on v5e/v6e).
    """
    try:
        vmem_bytes = int(pltpu.get_tpu_info().vmem_capacity_bytes)
    except Exception:  # pragma: no cover - conservative fallback (v7x floor)
        vmem_bytes = 64 << 20
    # Stay well under every generation's scoped-VMEM default so we never need
    # to raise vmem_limit_bytes.
    budget = min(vmem_bytes // 4, 16 << 20)
    max_rows = max(SUBLANE, (budget // row_bytes) // SUBLANE * SUBLANE)

    if block_batch is None:
        if batch <= max_rows:
            return batch, 1                 # whole batch in one step
        tb = min(1024, max_rows)            # large batch: big tiles, >=8 steps
    else:
        tb = min(block_batch, max_rows)
        if tb >= batch:
            return batch, 1
    tb = max(SUBLANE, (tb // SUBLANE) * SUBLANE)
    return tb, pl.cdiv(batch, tb)


@functools.partial(jax.jit, static_argnames=("block_batch",))
def custom_network_forward(x, params, *, block_batch=None):
    """Run the fused, batch-tiled MLP Pallas kernel.

    x      : (batch, in_features) f32
    params : output of prepare_params()
    block_batch : None -> auto (single step if the batch fits the VMEM budget);
                  int  -> cap on the batch tile (rounded to a multiple of 8).
    Returns (batch, out_dim) -- no padding, no post-kernel slicing.
    """
    num_layers = len(params) // 2
    batch, in_features = x.shape
    out_dim = params[-1].shape[1]

    # Per-row VMEM footprint: double-buffered x + out tiles plus f32 hidden
    # intermediates (one padded lane group per hidden layer).
    hidden_cols = sum(params[2 * i + 1].shape[1] for i in range(num_layers - 1))
    row_bytes = 4 * (2 * in_features + 2 * out_dim + hidden_cols)

    tb, steps = _pick_batch_tile(batch, row_bytes, block_batch)
    grid = (steps,)

    # x / out: batch-tiled (partial final block is masked by Pallas; rows are
    # independent so discarded garbage rows are harmless). Weights / biases:
    # full block with a constant index_map -> VMEM-resident across steps.
    in_specs = [pl.BlockSpec((tb, in_features), lambda i: (i, 0))]
    for p in params:
        in_specs.append(pl.BlockSpec(p.shape, lambda i: (0, 0)))

    flops = 2 * batch * sum(
        int(params[2 * i].shape[0]) * int(params[2 * i].shape[1])
        for i in range(num_layers))
    transcendentals = batch * hidden_cols
    bytes_accessed = int(
        x.size * x.dtype.itemsize
        + batch * out_dim * 4
        + sum(int(p.size) * p.dtype.itemsize for p in params))

    out = pl.pallas_call(
        _make_mlp_kernel(num_layers),
        out_shape=jax.ShapeDtypeStruct((batch, out_dim), x.dtype),
        grid=grid,
        in_specs=in_specs,
        out_specs=pl.BlockSpec((tb, out_dim), lambda i: (i, 0)),
        compiler_params=pltpu.CompilerParams(
            # megacore sharding of the batch axis on v7x; no-op on v5e/v6e
            dimension_semantics=("parallel",),
        ),
        cost_estimate=pl.CostEstimate(
            flops=flops,
            transcendentals=transcendentals,
            bytes_accessed=bytes_accessed,
        ),
    )(x, *params)

    return out


def xavier_uniform(key, out_features, in_features, dtype=jnp.float32):
    """Matches torch.nn.init.xavier_uniform_ (gain=1)."""
    bound = (6.0 / (in_features + out_features)) ** 0.5
    return jax.random.uniform(
        key, (out_features, in_features), dtype=dtype, minval=-bound, maxval=bound
    )


def init_custom_network(key, layer_sizes, dtype=jnp.float32):
    """Deterministic parameter init mirroring CustomNetwork.__init__ + init_weights."""
    weights, biases = [], []
    for i in range(len(layer_sizes) - 1):
        key, sub = jax.random.split(key)
        weights.append(xavier_uniform(sub, layer_sizes[i + 1], layer_sizes[i], dtype))
        biases.append(jnp.zeros((layer_sizes[i + 1],), dtype=dtype))
    return weights, biases


def reference_forward(x, weights, biases):
    """Pure-JAX reference mirroring the kernel's bf16-operand / f32-accum matmuls."""
    h = x.astype(jnp.float32)
    for i, (w, b) in enumerate(zip(weights, biases)):
        h = jnp.dot(h.astype(jnp.bfloat16), w.T.astype(jnp.bfloat16),
                    preferred_element_type=jnp.float32) + b.astype(jnp.float32)
        if i < len(weights) - 1:
            h = jnp.tanh(h)
    return h.astype(x.dtype)


if __name__ == "__main__":
    key = jax.random.PRNGKey(0)

    # Linear(32,64), Tanh, Linear(64,48), Tanh, Linear(48,16)
    layer_sizes = [32, 64, 48, 16]
    batch = 200  # deliberately not a multiple of 8/128: no pad, no slice needed

    key, pkey, xkey = jax.random.split(key, 3)
    weights, biases = init_custom_network(pkey, layer_sizes)
    x = jax.random.normal(xkey, (batch, layer_sizes[0]), dtype=jnp.float32)

    params = prepare_params(weights, biases)   # one-time layout prep (not per-call)
    ref = reference_forward(x, weights, biases)

    # 1) Default path: whole batch in a single grid step.
    out = jax.block_until_ready(custom_network_forward(x, params))
    assert out.shape == (batch, layer_sizes[-1])
    diff = float(jnp.max(jnp.abs(out - ref)))
    assert jnp.allclose(out, ref, atol=1e-4, rtol=1e-4), f"single-step mismatch: {diff}"

    # 2) Forced tiled path: 4 grid steps incl. a masked partial final block.
    out2 = jax.block_until_ready(custom_network_forward(x, params, block_batch=64))
    diff2 = float(jnp.max(jnp.abs(out2 - ref)))
    assert jnp.allclose(out2, ref, atol=1e-4, rtol=1e-4), f"tiled mismatch: {diff2}"

    print("KERNEL_OK")
</pallas_src>

<mosaic_0001>
module attributes {stable_mosaic.version = 11 : i64} {
  func.func @kernel(%arg0: i32, %arg1: memref<200x32xf32, #tpu.memory_space<vmem>>, %arg2: memref<32x128xbf16, #tpu.memory_space<vmem>>, %arg3: memref<1x128xf32, #tpu.memory_space<vmem>>, %arg4: memref<128x128xbf16, #tpu.memory_space<vmem>>, %arg5: memref<1x128xf32, #tpu.memory_space<vmem>>, %arg6: memref<128x16xbf16, #tpu.memory_space<vmem>>, %arg7: memref<1x16xf32, #tpu.memory_space<vmem>>, %arg8: memref<200x16xf32, #tpu.memory_space<vmem>>) attributes {dimension_semantics = [#tpu.dimension_semantics<parallel>], iteration_bounds = array<i64: 1>, scalar_prefetch = 0 : i64, scratch_operands = 0 : i64, tpu.core_type = #tpu.core_type<tc>, window_params = [{transform_indices = @transform_0, window_bounds = array<i64: 200, 32>}, {pipeline_mode = #tpu.pipeline_mode<synchronous>, transform_indices = @transform_1, window_bounds = array<i64: 32, 128>}, {pipeline_mode = #tpu.pipeline_mode<synchronous>, transform_indices = @transform_2, window_bounds = array<i64: 1, 128>}, {pipeline_mode = #tpu.pipeline_mode<synchronous>, transform_indices = @transform_3, window_bounds = array<i64: 128, 128>}, {pipeline_mode = #tpu.pipeline_mode<synchronous>, transform_indices = @transform_4, window_bounds = array<i64: 1, 128>}, {pipeline_mode = #tpu.pipeline_mode<synchronous>, transform_indices = @transform_5, window_bounds = array<i64: 128, 16>}, {pipeline_mode = #tpu.pipeline_mode<synchronous>, transform_indices = @transform_6, window_bounds = array<i64: 1, 16>}, {transform_indices = @transform_7, window_bounds = array<i64: 200, 16>}]} {
    %c0 = arith.constant 0 : index
    %c0_0 = arith.constant 0 : index
    %0 = vector.load %arg1[%c0, %c0_0] : memref<200x32xf32, #tpu.memory_space<vmem>>, vector<200x32xf32>
    %c0_1 = arith.constant 0 : index
    %c0_2 = arith.constant 0 : index
    %1 = vector.load %arg2[%c0_1, %c0_2] : memref<32x128xbf16, #tpu.memory_space<vmem>>, vector<32x128xbf16>
    %c0_3 = arith.constant 0 : index
    %c0_4 = arith.constant 0 : index
    %2 = vector.load %arg3[%c0_3, %c0_4] : memref<1x128xf32, #tpu.memory_space<vmem>>, vector<1x128xf32>
    %3 = arith.truncf %0 : vector<200x32xf32> to vector<200x32xbf16>
    %cst = arith.constant dense<0.000000e+00> : vector<200x128xf32>
    %4 = tpu.matmul %3, %1, %cst {dimension_numbers = #tpu.dot_dimension_numbers<[1], [0], [0], [1], [0, 0, 1, 1], [], []>} : vector<200x32xbf16>, vector<32x128xbf16>, vector<200x128xf32> -> vector<200x128xf32>
    %5 = vector.broadcast %2 : vector<1x128xf32> to vector<200x128xf32>
    %6 = arith.addf %4, %5 : vector<200x128xf32>
    %7 = math.tanh %6 : vector<200x128xf32>
    %c0_5 = arith.constant 0 : index
    %c0_6 = arith.constant 0 : index
    %8 = vector.load %arg4[%c0_5, %c0_6] : memref<128x128xbf16, #tpu.memory_space<vmem>>, vector<128x128xbf16>
    %c0_7 = arith.constant 0 : index
    %c0_8 = arith.constant 0 : index
    %9 = vector.load %arg5[%c0_7, %c0_8] : memref<1x128xf32, #tpu.memory_space<vmem>>, vector<1x128xf32>
    %10 = arith.truncf %7 : vector<200x128xf32> to vector<200x128xbf16>
    %cst_9 = arith.constant dense<0.000000e+00> : vector<200x128xf32>
    %11 = tpu.matmul %10, %8, %cst_9 {dimension_numbers = #tpu.dot_dimension_numbers<[1], [0], [0], [1], [0, 0, 1, 1], [], []>} : vector<200x128xbf16>, vector<128x128xbf16>, vector<200x128xf32> -> vector<200x128xf32>
    %12 = vector.broadcast %9 : vector<1x128xf32> to vector<200x128xf32>
    %13 = arith.addf %11, %12 : vector<200x128xf32>
    %14 = math.tanh %13 : vector<200x128xf32>
    %c0_10 = arith.constant 0 : index
    %c0_11 = arith.constant 0 : index
    %15 = vector.load %arg6[%c0_10, %c0_11] : memref<128x16xbf16, #tpu.memory_space<vmem>>, vector<128x16xbf16>
    %c0_12 = arith.constant 0 : index
    %c0_13 = arith.constant 0 : index
    %16 = vector.load %arg7[%c0_12, %c0_13] : memref<1x16xf32, #tpu.memory_space<vmem>>, vector<1x16xf32>
    %17 = arith.truncf %14 : vector<200x128xf32> to vector<200x128xbf16>
    %cst_14 = arith.constant dense<0.000000e+00> : vector<200x16xf32>
    %18 = tpu.matmul %17, %15, %cst_14 {dimension_numbers = #tpu.dot_dimension_numbers<[1], [0], [0], [1], [0, 0, 1, 1], [], []>} : vector<200x128xbf16>, vector<128x16xbf16>, vector<200x16xf32> -> vector<200x16xf32>
    %19 = vector.broadcast %16 : vector<1x16xf32> to vector<200x16xf32>
    %20 = arith.addf %18, %19 : vector<200x16xf32>
    %c0_15 = arith.constant 0 : index
    %c0_16 = arith.constant 0 : index
    %21 = vector.load %arg8[%c0_15, %c0_16] : memref<200x16xf32, #tpu.memory_space<vmem>>, vector<200x16xf32>
    tpu.vector_store %arg8[%c0_15, %c0_16], %20 {strides = array<i32>} : memref<200x16xf32, #tpu.memory_space<vmem>>, vector<200x16xf32>,
    return
  }
  func.func @transform_0(%arg0: i32) -> (i32, i32) {
    %c0_i32 = arith.constant 0 : i32
    %c0_i32_0 = arith.constant 0 : i32
    return %arg0, %c0_i32 : i32, i32
  }
  func.func @transform_1(%arg0: i32) -> (i32, i32) {
    %c0_i32 = arith.constant 0 : i32
    %c0_i32_0 = arith.constant 0 : i32
    %c0_i32_1 = arith.constant 0 : i32
    return %c0_i32, %c0_i32_0 : i32, i32
  }
  func.func @transform_2(%arg0: i32) -> (i32, i32) {
    %c0_i32 = arith.constant 0 : i32
    %c0_i32_0 = arith.constant 0 : i32
    %c0_i32_1 = arith.constant 0 : i32
    return %c0_i32, %c0_i32_0 : i32, i32
  }
  func.func @transform_3(%arg0: i32) -> (i32, i32) {
    %c0_i32 = arith.constant 0 : i32
    %c0_i32_0 = arith.constant 0 : i32
    %c0_i32_1 = arith.constant 0 : i32
    return %c0_i32, %c0_i32_0 : i32, i32
  }
  func.func @transform_4(%arg0: i32) -> (i32, i32) {
    %c0_i32 = arith.constant 0 : i32
    %c0_i32_0 = arith.constant 0 : i32
    %c0_i32_1 = arith.constant 0 : i32
    return %c0_i32, %c0_i32_0 : i32, i32
  }
  func.func @transform_5(%arg0: i32) -> (i32, i32) {
    %c0_i32 = arith.constant 0 : i32
    %c0_i32_0 = arith.constant 0 : i32
    %c0_i32_1 = arith.constant 0 : i32
    return %c0_i32, %c0_i32_0 : i32, i32
  }
  func.func @transform_6(%arg0: i32) -> (i32, i32) {
    %c0_i32 = arith.constant 0 : i32
    %c0_i32_0 = arith.constant 0 : i32
    %c0_i32_1 = arith.constant 0 : i32
    return %c0_i32, %c0_i32_0 : i32, i32
  }
  func.func @transform_7(%arg0: i32) -> (i32, i32) {
    %c0_i32 = arith.constant 0 : i32
    %c0_i32_0 = arith.constant 0 : i32
    return %arg0, %c0_i32 : i32, i32
  }
}

</mosaic_0001>

<bundles_post_ra>
// kernel: custom_network_forward.1
= control target key start
LH: loop header
LB: loop body
LE: loop exit
PB: predicated region body
PF: predicated region fallthrough
CT: control target
= control target key end

     0   :  { %v1191_v0 = vmov 0.0   ;;  %vm1192_vm0 = vmmov 0   ;;  %vm88_vm1 = vcmask 261120   ;;  %vm754_vm2 = vcmask 130048   ;;  %s1690_s1 = inlined_call_operand.vmem [shape: bf16[32,128], index: 1, kind: input, shape index: {}]   ;;  %s1691_s0 = inlined_call_operand.vmem [shape: f32[200,32], index: 0, kind: input, shape index: {}]   ;;  %s1692_s3 = inlined_call_operand.vmem [shape: bf16[128,128], index: 3, kind: input, shape index: {}]   ;;  %s1693_s5 = inlined_call_operand.vmem [shape: bf16[128,16], index: 5, kind: input, shape index: {}]   ;;  %s1694_s2 = inlined_call_operand.vmem [shape: f32[1,128], index: 2, kind: input, shape index: {}]   ;;  %s1695_s4 = inlined_call_operand.vmem [shape: f32[1,128], index: 4, kind: input, shape index: {}]   ;;  %s1696_s6 = inlined_call_operand.vmem [shape: f32[1,16], index: 6, kind: input, shape index: {}]   ;;  %s1697_s7 = inlined_call_operand.vmem [shape: f32[200,16], index: 7, kind: output, shape index: {}]  }
   0x1   :  { %875 = vmatprep.subr.bf16.mxu0 %v1191_v0  ;;  %v1073_v1 = vld [vmem:[%s1690_s1] sm:$0xff]   ;;  %879 = vmatprep.mubr.msk.bf16.mxu0 %vm1192_vm0, %v1191_v0  ;;  %v1074_v2 = vld [vmem:[%s1690_s1 + $0x8] sm:$0xff]   ;;  %v41_v6 = vld [vmem:[%s1691_s0 + $0x70] sm:$0xff] }
   0x2   :  { %1067 = vmatprep.subr.bf16.mxu1 %v1191_v0  ;;  %907 = vmatprep.mubr.msk.bf16.mxu1 %vm1192_vm0, %v1191_v0  ;;  %v27_v3 = vld [vmem:[%s1691_s0] sm:$0xff]  ;;  %v28_v4 = vld [vmem:[%s1691_s0 + $0x8] sm:$0xff]  ;;  %v42_v7 = vld [vmem:[%s1691_s0 + $0x78] sm:$0xff] }
   0x3   :  { %876 = vmatpush3.bf16.msra.mxu0 %v1073_v1  ;;  %1069 = vmatpush3.bf16.msra.mxu1 %v1073_v1  ;;  %v57_v5 = vpack.c.bf16 %v28_v4, %v27_v3  ;;  %v64_v8 = vpack.c.bf16 %v42_v7, %v41_v6  ;;  %v29_v9 = vld [vmem:[%s1691_s0 + $0x10] sm:$0xff]  ;;  %v30_v10 = vld [vmem:[%s1691_s0 + $0x18] sm:$0xff]  ;;  %v43_v11 = vld [vmem:[%s1691_s0 + $0x80] sm:$0xff] }
   0x4   :  { %877 = vmatprep.subr.bf16.mxu0 %v1191_v0  ;;  %1068 = vmatprep.subr.bf16.mxu1 %v1191_v0  ;;  %v44_v12 = vld [vmem:[%s1691_s0 + $0x88] sm:$0xff]  ;;  %v1075_v13 = vld [vmem:[%s1692_s3] sm:$0xff]   ;;  %v58_v14 = vpack.c.bf16 %v30_v10, %v29_v9  ;;  %v1077_v17 = vld [vmem:[%s1692_s3 + $0x10] sm:$0xff]  }
   0x5   :  { %v1076_v15 = vld [vmem:[%s1692_s3 + $0x8] sm:$0xff]   ;;  %v65_v16 = vpack.c.bf16 %v44_v12, %v43_v11  ;;  %v31_v18 = vld [vmem:[%s1691_s0 + $0x20] sm:$0xff]  ;;  %v45_v20 = vld [vmem:[%s1691_s0 + $0x90] sm:$0xff] }
   0x6   :  { %v32_v19 = vld [vmem:[%s1691_s0 + $0x28] sm:$0xff]  ;;  %v46_v21 = vld [vmem:[%s1691_s0 + $0x98] sm:$0xff]  ;;  %v1079_v25 = vld [vmem:[%s1692_s3 + $0x20] sm:$0xff]  }
   0x7   :  { %878 = vmatpush3.bf16.msra.mxu0 %v1074_v2  ;;  %1070 = vmatpush3.bf16.msra.mxu1 %v1074_v2  ;;  %v59_v22 = vpack.c.bf16 %v32_v19, %v31_v18  ;;  %v1078_v23 = vld [vmem:[%s1692_s3 + $0x18] sm:$0xff]   ;;  %v66_v24 = vpack.c.bf16 %v46_v21, %v45_v20  ;;  %v33_v26 = vld [vmem:[%s1691_s0 + $0x30] sm:$0xff]  ;;  %v47_v28 = vld [vmem:[%s1691_s0 + $0xa0] sm:$0xff] }
   0x8   :  { %931 = vmatprep.subr.bf16.mxu1 %v1191_v0  ;;  %999 = vmatprep.subr.bf16.mxu0 %v1191_v0  ;;  %v34_v27 = vld [vmem:[%s1691_s0 + $0x38] sm:$0xff]  ;;  %v48_v29 = vld [vmem:[%s1691_s0 + $0xa8] sm:$0xff]  ;;  %v35_v32 = vld [vmem:[%s1691_s0 + $0x40] sm:$0xff] }
   0x9   :  { %v60_v30 = vpack.c.bf16 %v34_v27, %v33_v26  ;;  %v67_v31 = vpack.c.bf16 %v48_v29, %v47_v28  ;;  %v36_v33 = vld [vmem:[%s1691_s0 + $0x48] sm:$0xff]  ;;  %v49_v34 = vld [vmem:[%s1691_s0 + $0xb0] sm:$0xff]  ;;  %v50_v35 = vld [vmem:[%s1691_s0 + $0xb8] sm:$0xff] }
   0xa   :  { %880 = vmatmul.mubr.msk.bf16.vlgmr.msra.gmra.mrb[0].mxu0 %vm88_vm1, %v57_v5  ;;  %908 = vmatmul.mubr.msk.bf16.vlgmr.msra.gmra.mrb[0].mxu1 %vm88_vm1, %v64_v8  ;;  %v61_v36 = vpack.c.bf16 %v36_v33, %v35_v32  ;;  %v68_v37 = vpack.c.bf16 %v50_v35, %v49_v34  ;;  %v37_v38 = vld [vmem:[%s1691_s0 + $0x50] sm:$0xff]  ;;  %v38_v39 = vld [vmem:[%s1691_s0 + $0x58] sm:$0xff]  ;;  %v51_v40 = vld [vmem:[%s1691_s0 + $0xc0] sm:$0xff] }
   0xb   :  { %883 = vmatprep.mubr.msk.bf16.mxu0 %vm1192_vm0, %v1191_v0  ;;  %911 = vmatprep.mubr.msk.bf16.mxu1 %vm1192_vm0, %v1191_v0  ;;  %v62_v41 = vpack.c.bf16 %v38_v39, %v37_v38  ;;  %v69_v42 = vpack.c.bf16 %v51_v40, %v51_v40  ;;  %v39_v43 = vld [vmem:[%s1691_s0 + $0x60] sm:$0xff]  ;;  %v40_v44 = vld [vmem:[%s1691_s0 + $0x68] sm:$0xff]  ;;  %v1081_v47 = vld [vmem:[%s1692_s3 + $0x30] sm:$0xff]  }
   0xc   :  { %932 = vmatpush3.bf16.msra.mxu1 %v1075_v13  ;;  %v63_v45 = vpack.c.bf16 %v40_v44, %v39_v43  ;;  %v1080_v46 = vld [vmem:[%s1692_s3 + $0x28] sm:$0xff]   ;;  %v1082_v48 = vld [vmem:[%s1692_s3 + $0x38] sm:$0xff]   ;;  %v1083_v49 = vld [vmem:[%s1693_s5] sm:$0xff]  }
   0xd   :  { %933 = vmatprep.subr.bf16.mxu1 %v1191_v0  ;;  %1000 = vmatpush3.bf16.msra.mxu0 %v1083_v49  ;;  %v1084_v50 = vld [vmem:[%s1693_s5 + $0x8] sm:$0xff]   ;;  %v1085_v51 = vld [vmem:[%s1693_s5 + $0x10] sm:$0xff]   ;;  %v1086_v52 = vld [vmem:[%s1693_s5 + $0x18] sm:$0xff]  }
   0xe   :  { %1001 = vmatprep.subr.bf16.mxu0 %v1191_v0  ;;  %v1411_v53 = vld [vmem:[%s1694_s2] ss:$0 sm:$0xff]  ;;  %v1088_v4 = vld [vmem:[%s1693_s5 + $0x28] sm:$0xff]  }
   0xf   :  { %v1087_v58 = vld [vmem:[%s1693_s5 + $0x20] sm:$0xff]  }
  0x10   :  { %934 = vmatpush3.bf16.msra.mxu1 %v1076_v15 }
  0x11   :  { %935 = vmatprep.subr.bf16.mxu1 %v1191_v0  ;;  %1002 = vmatpush3.bf16.msra.mxu0 %v1084_v50 }
  0x12   :  { %884 = vmatmul.mubr.msk.bf16.gmra.mrb[4].mxu0 %vm88_vm1, %v58_v14  ;;  %912 = vmatmul.mubr.msk.bf16.gmra.mrb[4].mxu1 %vm88_vm1, %v65_v16 }
  0x13   :  { %887 = vmatprep.mubr.msk.bf16.mxu0 %vm1192_vm0, %v1191_v0  ;;  %915 = vmatprep.mubr.msk.bf16.mxu1 %vm1192_vm0, %v1191_v0 }
  0x14   :  { %936 = vmatpush3.bf16.msra.mxu1 %v1077_v17  ;;  %1003 = vmatprep.subr.bf16.mxu0 %v1191_v0 }
  0x15   :  { %937 = vmatprep.subr.bf16.mxu1 %v1191_v0  ;;  %1004 = vmatpush3.bf16.msra.mxu0 %v1085_v51 }
  0x16   :  { %1005 = vmatprep.subr.bf16.mxu0 %v1191_v0 }
  0x18   :  { %938 = vmatpush3.bf16.msra.mxu1 %v1078_v23 }
  0x19   :  { %939 = vmatprep.subr.bf16.mxu1 %v1191_v0  ;;  %1006 = vmatpush3.bf16.msra.mxu0 %v1086_v52 }
  0x1a   :  { %888 = vmatmul.mubr.msk.bf16.gmra.mrb[8].mxu0 %vm88_vm1, %v59_v22  ;;  %916 = vmatmul.mubr.msk.bf16.gmra.mrb[8].mxu1 %vm88_vm1, %v66_v24 }
  0x1b   :  { %891 = vmatprep.mubr.msk.bf16.mxu0 %vm1192_vm0, %v1191_v0  ;;  %919 = vmatprep.mubr.msk.bf16.mxu1 %vm1192_vm0, %v1191_v0 }
  0x1c   :  { %940 = vmatpush3.bf16.msra.mxu1 %v1079_v25  ;;  %1007 = vmatprep.subr.bf16.mxu0 %v1191_v0 }
  0x1d   :  { %941 = vmatprep.subr.bf16.mxu1 %v1191_v0  ;;  %1008 = vmatpush3.bf16.msra.mxu0 %v1087_v58 }
  0x1e   :  { %1009 = vmatprep.subr.bf16.mxu0 %v1191_v0 }
  0x20   :  { %942 = vmatpush3.bf16.msra.mxu1 %v1080_v46 }
  0x21   :  { %943 = vmatprep.subr.bf16.mxu1 %v1191_v0  ;;  %1010 = vmatpush3.bf16.msra.mxu0 %v1088_v4 }
  0x22   :  { %892 = vmatmul.mubr.msk.bf16.gmra.mrb[12].mxu0 %vm88_vm1, %v60_v30  ;;  %920 = vmatmul.mubr.msk.bf16.gmra.mrb[12].mxu1 %vm88_vm1, %v67_v31 }
  0x23   :  { %895 = vmatprep.mubr.msk.bf16.mxu0 %vm1192_vm0, %v1191_v0  ;;  %923 = vmatprep.mubr.msk.bf16.mxu1 %vm1192_vm0, %v1191_v0 }
  0x24   :  { %944 = vmatpush3.bf16.msra.mxu1 %v1081_v47  ;;  %1011 = vmatprep.subr.bf16.mxu0 %v1191_v0 }
  0x25   :  { %945 = vmatprep.subr.bf16.mxu1 %v1191_v0 }
  0x28   :  { %946 = vmatpush3.bf16.msra.mxu1 %v1082_v48 }
  0x2a   :  { %896 = vmatmul.mubr.msk.bf16.gmra.mrb[16].mxu0 %vm88_vm1, %v61_v36  ;;  %924 = vmatmul.mubr.msk.bf16.gmra.mrb[16].mxu1 %vm88_vm1, %v68_v37 }
  0x2b   :  { %899 = vmatprep.mubr.msk.bf16.mxu0 %vm1192_vm0, %v1191_v0  ;;  %927 = vmatprep.mubr.msk.bf16.mxu1 %vm1192_vm0, %v1191_v0 }
  0x32   :  { %900 = vmatmul.mubr.msk.bf16.gmra.mrb[20].mxu0 %vm88_vm1, %v62_v41  ;;  %928 = vmatmul.mubr.msk.bf16.gmra.mrb[20].mxu1 %vm88_vm1, %v69_v42 }
  0x33   :  { %903 = vmatprep.mubr.msk.bf16.mxu0 %vm1192_vm0, %v1191_v0  ;;  %947 = vmatprep.mubr.msk.bf16.mxu1 %vm1192_vm0, %v1191_v0 }
  0x3a   :  { %904 = vmatmul.mubr.msk.bf16.gmra.mrb[24].mxu0 %vm88_vm1, %v63_v45 }
  0x3b   :  { %1015 = vmatprep.mubr.msk.bf16.mxu0 %vm1192_vm0, %v1191_v0 }
  0xdd   :  { %v162_v54 = vpop.f32.mrb[0].mxu0  ;;  %v218_v57 = vpop.f32.mrb[0].mxu1 }
  0xde   :  { %v163_v55 = vadd.f32 %v1411_v53, %v162_v54  ;;  %v881_v56 = vpop.f32.mrb[1].mxu0  ;;  %v219_v60 = vadd.f32 %v1411_v53, %v218_v57  ;;  %v909_v61 = vpop.f32.mrb[1].mxu1 }
  0xdf   :  { %v165_v59 = vpop.f32.mrb[2].mxu0  ;;  %v221_v1 = vpop.f32.mrb[2].mxu1 }
  0xe0   :  { %1091 = vtanh.f32 %v163_v55  ;;  %v166_v62 = vadd.f32 %v1411_v53, %v165_v59  ;;  %v882_v63 = vpop.f32.mrb[3].mxu0  ;;  %v222_v2 = vadd.f32 %v1411_v53, %v221_v1  ;;  %v910_v3 = vpop.f32.mrb[3].mxu1 }
  0xe1   :  { %1093 = vtanh.f32 %v219_v60 }
  0xe2   :  { %1095 = vtanh.f32 %v166_v62 }
  0xe3   :  { %1097 = vtanh.f32 %v222_v2 }
  0xe5   :  { %v170_v5 = vpop.f32.mrb[4].mxu0  ;;  %v226_v8 = vpop.f32.mrb[4].mxu1 }
  0xe6   :  { %v171_v6 = vadd.f32 %v1411_v53, %v170_v5  ;;  %v885_v7 = vpop.f32.mrb[5].mxu0  ;;  %v227_v10 = vadd.f32 %v1411_v53, %v226_v8  ;;  %v913_v11 = vpop.f32.mrb[5].mxu1 }
  0xe7   :  { %v173_v9 = vpop.f32.mrb[6].mxu0  ;;  %v229_v14 = vpop.f32.mrb[6].mxu1 }
  0xe8   :  { %1099 = vtanh.f32 %v171_v6  ;;  %v174_v12 = vadd.f32 %v1411_v53, %v173_v9  ;;  %v886_v13 = vpop.f32.mrb[7].mxu0  ;;  %v230_v15 = vadd.f32 %v1411_v53, %v229_v14  ;;  %v914_v16 = vpop.f32.mrb[7].mxu1 }
  0xe9   :  { %1101 = vtanh.f32 %v227_v10 }
  0xea   :  { %v1092_v17 = vpop.eup %1091  ;;  %1103 = vtanh.f32 %v174_v12 }
  0xeb   :  { %v1431_v18 = vpop.eup %1093  ;;  %1105 = vtanh.f32 %v230_v15 }
  0xec   :  { %v1096_v19 = vpop.eup %1095 }
  0xed   :  { %v1433_v20 = vpop.eup %1097  ;;  %v178_v21 = vpop.f32.mrb[8].mxu0  ;;  %v306_v22 = vpack.c.bf16 %v1096_v19, %v1092_v17 }
  0xee   :  { %v179_v23 = vadd.f32 %v1411_v53, %v178_v21  ;;  %v889_v24 = vpop.f32.mrb[9].mxu0  ;;  %v234_v25 = vpop.f32.mrb[8].mxu1  ;;  %v313_v26 = vpack.c.bf16 %v1433_v20, %v1431_v18 }
  0xef   :  { %v181_v27 = vpop.f32.mrb[10].mxu0  ;;  %948 = vmatmul.mubr.bf16.vlgmr.msra.gmra.mrb[24].mxu1 %v306_v22  ;;  %v235_v28 = vadd.f32 %v1411_v53, %v234_v25  ;;  %v917_v29 = vpop.f32.mrb[9].mxu1 }
  0xf0   :  { %1107 = vtanh.f32 %v179_v23  ;;  %v182_v30 = vadd.f32 %v1411_v53, %v181_v27  ;;  %v890_v31 = vpop.f32.mrb[11].mxu0  ;;  %951 = vmatprep.mubr.msk.bf16.mxu1 %vm1192_vm0, %v1191_v0  ;;  %v237_v32 = vpop.f32.mrb[10].mxu1 }
  0xf1   :  { %1109 = vtanh.f32 %v235_v28  ;;  %v238_v33 = vadd.f32 %v1411_v53, %v237_v32  ;;  %v918_v34 = vpop.f32.mrb[11].mxu1 }
  0xf2   :  { %v1100_v35 = vpop.eup %1099  ;;  %1111 = vtanh.f32 %v182_v30 }
  0xf3   :  { %v1443_v36 = vpop.eup %1101  ;;  %1113 = vtanh.f32 %v238_v33 }
  0xf4   :  { %v1104_v37 = vpop.eup %1103 }
  0xf5   :  { %v1445_v38 = vpop.eup %1105  ;;  %v186_v39 = vpop.f32.mrb[12].mxu0  ;;  %v307_v40 = vpack.c.bf16 %v1104_v37, %v1100_v35 }
  0xf6   :  { %v187_v41 = vadd.f32 %v1411_v53, %v186_v39  ;;  %v893_v42 = vpop.f32.mrb[13].mxu0  ;;  %v242_v43 = vpop.f32.mrb[12].mxu1  ;;  %v314_v44 = vpack.c.bf16 %v1445_v38, %v1443_v36  ;;  %v1509_v36 = vld [vmem:[%s1695_s4] ss:$0 sm:$0xff] }
  0xf7   :  { %v189_v45 = vpop.f32.mrb[14].mxu0  ;;  %952 = vmatmul.mubr.bf16.gmra.mrb[28].mxu1 %v307_v40  ;;  %v243_v46 = vadd.f32 %v1411_v53, %v242_v43  ;;  %v921_v47 = vpop.f32.mrb[13].mxu1 }
  0xf8   :  { %1115 = vtanh.f32 %v187_v41  ;;  %v190_v48 = vadd.f32 %v1411_v53, %v189_v45  ;;  %v894_v49 = vpop.f32.mrb[15].mxu0  ;;  %955 = vmatprep.mubr.msk.bf16.mxu1 %vm1192_vm0, %v1191_v0  ;;  %v245_v50 = vpop.f32.mrb[14].mxu1 }
  0xf9   :  { %1117 = vtanh.f32 %v243_v46  ;;  %v246_v51 = vadd.f32 %v1411_v53, %v245_v50  ;;  %v922_v52 = vpop.f32.mrb[15].mxu1 }
  0xfa   :  { %v1108_v54 = vpop.eup %1107  ;;  %1119 = vtanh.f32 %v190_v48 }
  0xfb   :  { %v1455_v55 = vpop.eup %1109  ;;  %1121 = vtanh.f32 %v246_v51 }
  0xfc   :  { %v1112_v56 = vpop.eup %1111 }
  0xfd   :  { %v1457_v57 = vpop.eup %1113  ;;  %v194_v58 = vpop.f32.mrb[16].mxu0  ;;  %v308_v59 = vpack.c.bf16 %v1112_v56, %v1108_v54 }
  0xfe   :  { %v195_v60 = vadd.f32 %v1411_v53, %v194_v58  ;;  %v897_v61 = vpop.f32.mrb[17].mxu0  ;;  %v250_v62 = vpop.f32.mrb[16].mxu1  ;;  %v315_v63 = vpack.c.bf16 %v1457_v57, %v1455_v55 }
  0xff   :  { %v197_v1 = vpop.f32.mrb[18].mxu0  ;;  %956 = vmatmul.mubr.bf16.gmra.mrb[32].mxu1 %v308_v59  ;;  %v251_v2 = vadd.f32 %v1411_v53, %v250_v62  ;;  %v925_v3 = vpop.f32.mrb[17].mxu1 }
 0x100   :  { %1123 = vtanh.f32 %v195_v60  ;;  %v198_v4 = vadd.f32 %v1411_v53, %v197_v1  ;;  %v898_v5 = vpop.f32.mrb[19].mxu0  ;;  %959 = vmatprep.mubr.msk.bf16.mxu1 %vm1192_vm0, %v1191_v0  ;;  %v253_v6 = vpop.f32.mrb[18].mxu1 }
 0x101   :  { %1125 = vtanh.f32 %v251_v2  ;;  %v254_v7 = vadd.f32 %v1411_v53, %v253_v6  ;;  %v926_v8 = vpop.f32.mrb[19].mxu1 }
 0x102   :  { %v1116_v9 = vpop.eup %1115  ;;  %1127 = vtanh.f32 %v198_v4 }
 0x103   :  { %v1118_v10 = vpop.eup %1117  ;;  %1129 = vtanh.f32 %v254_v7 }
 0x104   :  { %v1120_v11 = vpop.eup %1119 }
 0x105   :  { %v1122_v12 = vpop.eup %1121  ;;  %v202_v13 = vpop.f32.mrb[20].mxu0  ;;  %v309_v14 = vpack.c.bf16 %v1120_v11, %v1116_v9 }
 0x106   :  { %v203_v15 = vadd.f32 %v1411_v53, %v202_v13  ;;  %v901_v16 = vpop.f32.mrb[21].mxu0  ;;  %v258_v17 = vpop.f32.mrb[20].mxu1  ;;  %v316_v19 = vpack.c.bf16 %v1122_v12, %v1118_v10 }
 0x107   :  { %v205_v21 = vpop.f32.mrb[22].mxu0  ;;  %960 = vmatmul.mubr.bf16.gmra.mrb[36].mxu1 %v309_v14  ;;  %v259_v22 = vadd.f32 %v1411_v53, %v258_v17  ;;  %v929_v23 = vpop.f32.mrb[21].mxu1 }
 0x108   :  { %v206_v24 = vadd.f32 %v1411_v53, %v205_v21  ;;  %v902_v25 = vpop.f32.mrb[23].mxu0  ;;  %963 = vmatprep.mubr.msk.bf16.mxu1 %vm1192_vm0, %v1191_v0  ;;  %v261_v27 = vpop.f32.mrb[22].mxu1  ;;  %1131 = vtanh.f32 %v203_v15 }
 0x109   :  { %v930_v28 = vpop.f32.mrb[23].mxu1 }
 0x10a   :  { %v1124_v29 = vpop.eup %1123  ;;  %1133 = vtanh.f32 %v206_v24 }
 0x10b   :  { %v1126_v30 = vpop.eup %1125 }
 0x10c   :  { %v1128_v31 = vpop.eup %1127 }
 0x10d   :  { %v1130_v32 = vpop.eup %1129  ;;  %v210_v33 = vpop.f32.mrb[24].mxu0  ;;  %v310_v34 = vpack.c.bf16 %v1128_v31, %v1124_v29 }
 0x10e   :  { %v211_v35 = vadd.f32 %v1411_v53, %v210_v33  ;;  %v905_v37 = vpop.f32.mrb[25].mxu0  ;;  %v317_v39 = vpack.c.bf16 %v1130_v32, %v1126_v30 }
 0x10f   :  { %v213_v40 = vpop.f32.mrb[26].mxu0  ;;  %964 = vmatmul.mubr.bf16.gmra.mrb[40].mxu1 %v310_v34 }
 0x110   :  { %v214_v41 = vadd.f32 %v1411_v53, %v213_v40  ;;  %v906_v42 = vpop.f32.mrb[27].mxu0  ;;  %967 = vmatprep.mubr.msk.bf16.mxu1 %vm1192_vm0, %v1191_v0  ;;  %1135 = vtanh.f32 %v211_v35  ;;  %v1089_v53 = vld [vmem:[%s1693_s5 + $0x30] sm:$0xff]  }
 0x111   :  { %1012 = vmatpush3.bf16.msra.mxu0 %v1089_v53 }
 0x112   :  { %1137 = vtanh.f32 %v214_v41  ;;  %v1132_v43 = vpop.eup %1131  ;;  %1013 = vmatprep.subr.bf16.mxu0 %v1191_v0 }
 0x113   :  { %1139 = vtanh.f32 %v259_v22 }
 0x114   :  { %v1134_v45 = vpop.eup %1133 }
 0x115   :  { %v311_v46 = vpack.c.bf16 %v1134_v45, %v1132_v43 }
 0x117   :  { %968 = vmatmul.mubr.bf16.gmra.mrb[44].mxu1 %v311_v46 }
 0x118   :  { %971 = vmatprep.mubr.msk.bf16.mxu1 %vm1192_vm0, %v1191_v0 }
 0x11a   :  { %v1136_v47 = vpop.eup %1135 }
 0x11c   :  { %v1138_v48 = vpop.eup %1137 }
 0x11d   :  { %v312_v49 = vpack.c.bf16 %v1138_v48, %v1136_v47  ;;  %v1140_v18 = vpop.eup %1139 }
 0x11e   :  { %v318_v20 = vpack.c.bf16 %v1140_v18, %v1140_v18 }
 0x11f   :  { %972 = vmatmul.mubr.bf16.gmra.mrb[48].mxu1 %v312_v49 }
 0x120   :  { %975 = vmatprep.mubr.msk.bf16.mxu1 %vm1192_vm0, %v1191_v0 }
 0x127   :  { %976 = vmatmul.mubr.bf16.gmra.mrb[52].mxu1 %v313_v26  ;;  %v1090_v26 = vld [vmem:[%s1693_s5 + $0x38] sm:$0xff]  }
 0x128   :  { %979 = vmatprep.mubr.msk.bf16.mxu1 %vm1192_vm0, %v1191_v0  ;;  %1014 = vmatpush3.bf16.msra.mxu0 %v1090_v26 }
 0x12f   :  { %980 = vmatmul.mubr.bf16.gmra.mrb[56].mxu1 %v314_v44 }
 0x130   :  { %983 = vmatprep.mubr.msk.bf16.mxu1 %vm1192_vm0, %v1191_v0 }
 0x137   :  { %984 = vmatmul.mubr.bf16.gmra.mrb[60].mxu1 %v315_v63 }
 0x138   :  { %987 = vmatprep.mubr.msk.bf16.mxu1 %vm1192_vm0, %v1191_v0 }
 0x13f   :  { %988 = vmatmul.mubr.bf16.gmra.mrb[64].mxu1 %v316_v19 }
 0x140   :  { %991 = vmatprep.mubr.msk.bf16.mxu1 %vm1192_vm0, %v1191_v0 }
 0x147   :  { %992 = vmatmul.mubr.bf16.gmra.mrb[68].mxu1 %v317_v39 }
 0x148   :  { %995 = vmatprep.mubr.msk.bf16.mxu1 %vm1192_vm0, %v1191_v0 }
 0x14f   :  { %996 = vmatmul.mubr.bf16.gmra.mrb[72].mxu1 %v318_v20 }
 0x1c2   :  { %v407_v38 = vpop.f32.mrb[24].mxu1 }
 0x1c3   :  { %v408_v44 = vadd.f32 %v1509_v36, %v407_v38  ;;  %v949_v50 = vpop.f32.mrb[25].mxu1 }
 0x1c4   :  { %v410_v51 = vpop.f32.mrb[26].mxu1 }
 0x1c5   :  { %v411_v52 = vadd.f32 %v1509_v36, %v410_v51  ;;  %v950_v54 = vpop.f32.mrb[27].mxu1  ;;  %1141 = vtanh.f32 %v408_v44 }
 0x1c7   :  { %1143 = vtanh.f32 %v411_v52 }
 0x1ca   :  { %v415_v55 = vpop.f32.mrb[28].mxu1 }
 0x1cb   :  { %v416_v56 = vadd.f32 %v1509_v36, %v415_v55  ;;  %v953_v57 = vpop.f32.mrb[29].mxu1 }
 0x1cc   :  { %v418_v58 = vpop.f32.mrb[30].mxu1 }
 0x1cd   :  { %v419_v59 = vadd.f32 %v1509_v36, %v418_v58  ;;  %v954_v60 = vpop.f32.mrb[31].mxu1  ;;  %1145 = vtanh.f32 %v416_v56 }
 0x1cf   :  { %1147 = vtanh.f32 %v419_v59  ;;  %v1142_v61 = vpop.eup %1141 }
 0x1d1   :  { %v1144_v62 = vpop.eup %1143 }
 0x1d2   :  { %v423_v63 = vpop.f32.mrb[32].mxu1  ;;  %v551_v1 = vpack.c.bf16 %v1144_v62, %v1142_v61 }
 0x1d3   :  { %v424_v2 = vadd.f32 %v1509_v36, %v423_v63  ;;  %v957_v3 = vpop.f32.mrb[33].mxu1 }
 0x1d4   :  { %v426_v4 = vpop.f32.mrb[34].mxu1  ;;  %1016 = vmatmul.mubr.bf16.vlgmr.msra.gmra.mrb[28].mxu0 %v551_v1 }
 0x1d5   :  { %v427_v5 = vadd.f32 %v1509_v36, %v426_v4  ;;  %v958_v6 = vpop.f32.mrb[35].mxu1  ;;  %1019 = vmatprep.mubr.msk.bf16.mxu0 %vm1192_vm0, %v1191_v0  ;;  %1149 = vtanh.f32 %v424_v2 }
 0x1d7   :  { %1151 = vtanh.f32 %v427_v5  ;;  %v1146_v7 = vpop.eup %1145 }
 0x1d9   :  { %v1148_v8 = vpop.eup %1147 }
 0x1da   :  { %v431_v9 = vpop.f32.mrb[36].mxu1  ;;  %v552_v10 = vpack.c.bf16 %v1148_v8, %v1146_v7 }
 0x1db   :  { %v432_v11 = vadd.f32 %v1509_v36, %v431_v9  ;;  %v961_v12 = vpop.f32.mrb[37].mxu1 }
 0x1dc   :  { %v434_v13 = vpop.f32.mrb[38].mxu1  ;;  %1020 = vmatmul.mubr.bf16.gmra.mrb[32].mxu0 %v552_v10 }
 0x1dd   :  { %v435_v14 = vadd.f32 %v1509_v36, %v434_v13  ;;  %v962_v15 = vpop.f32.mrb[39].mxu1  ;;  %1023 = vmatprep.mubr.msk.bf16.mxu0 %vm1192_vm0, %v1191_v0  ;;  %1153 = vtanh.f32 %v432_v11 }
 0x1df   :  { %1155 = vtanh.f32 %v435_v14  ;;  %v1150_v16 = vpop.eup %1149 }
 0x1e1   :  { %v1152_v17 = vpop.eup %1151 }
 0x1e2   :  { %v439_v19 = vpop.f32.mrb[40].mxu1  ;;  %v553_v21 = vpack.c.bf16 %v1152_v17, %v1150_v16 }
 0x1e3   :  { %v440_v22 = vadd.f32 %v1509_v36, %v439_v19  ;;  %v965_v23 = vpop.f32.mrb[41].mxu1 }
 0x1e4   :  { %v442_v24 = vpop.f32.mrb[42].mxu1  ;;  %1024 = vmatmul.mubr.bf16.gmra.mrb[36].mxu0 %v553_v21 }
 0x1e5   :  { %v443_v25 = vadd.f32 %v1509_v36, %v442_v24  ;;  %v966_v27 = vpop.f32.mrb[43].mxu1  ;;  %1027 = vmatprep.mubr.msk.bf16.mxu0 %vm1192_vm0, %v1191_v0  ;;  %1157 = vtanh.f32 %v440_v22 }
 0x1e7   :  { %1159 = vtanh.f32 %v443_v25  ;;  %v1154_v28 = vpop.eup %1153 }
 0x1e9   :  { %v1156_v29 = vpop.eup %1155 }
 0x1ea   :  { %v447_v30 = vpop.f32.mrb[44].mxu1  ;;  %v554_v31 = vpack.c.bf16 %v1156_v29, %v1154_v28 }
 0x1eb   :  { %v448_v32 = vadd.f32 %v1509_v36, %v447_v30  ;;  %v969_v33 = vpop.f32.mrb[45].mxu1 }
 0x1ec   :  { %v450_v34 = vpop.f32.mrb[46].mxu1  ;;  %1028 = vmatmul.mubr.bf16.gmra.mrb[40].mxu0 %v554_v31 }
 0x1ed   :  { %v451_v35 = vadd.f32 %v1509_v36, %v450_v34  ;;  %v970_v37 = vpop.f32.mrb[47].mxu1  ;;  %1031 = vmatprep.mubr.msk.bf16.mxu0 %vm1192_vm0, %v1191_v0  ;;  %1161 = vtanh.f32 %v448_v32 }
 0x1ef   :  { %1163 = vtanh.f32 %v451_v35  ;;  %v1158_v39 = vpop.eup %1157 }
 0x1f1   :  { %v1160_v40 = vpop.eup %1159 }
 0x1f2   :  { %v455_v41 = vpop.f32.mrb[48].mxu1  ;;  %v555_v42 = vpack.c.bf16 %v1160_v40, %v1158_v39 }
 0x1f3   :  { %v456_v43 = vadd.f32 %v1509_v36, %v455_v41  ;;  %v973_v45 = vpop.f32.mrb[49].mxu1 }
 0x1f4   :  { %v458_v46 = vpop.f32.mrb[50].mxu1  ;;  %1032 = vmatmul.mubr.bf16.gmra.mrb[44].mxu0 %v555_v42 }
 0x1f5   :  { %v459_v47 = vadd.f32 %v1509_v36, %v458_v46  ;;  %v974_v48 = vpop.f32.mrb[51].mxu1  ;;  %1035 = vmatprep.mubr.msk.bf16.mxu0 %vm1192_vm0, %v1191_v0  ;;  %1165 = vtanh.f32 %v456_v43 }
 0x1f7   :  { %1167 = vtanh.f32 %v459_v47  ;;  %v1162_v49 = vpop.eup %1161 }
 0x1f9   :  { %v1164_v53 = vpop.eup %1163 }
 0x1fa   :  { %v463_v18 = vpop.f32.mrb[52].mxu1  ;;  %v556_v20 = vpack.c.bf16 %v1164_v53, %v1162_v49 }
 0x1fb   :  { %v464_v26 = vadd.f32 %v1509_v36, %v463_v18  ;;  %v977_v38 = vpop.f32.mrb[53].mxu1 }
 0x1fc   :  { %v466_v44 = vpop.f32.mrb[54].mxu1  ;;  %1036 = vmatmul.mubr.bf16.gmra.mrb[48].mxu0 %v556_v20 }
 0x1fd   :  { %v467_v50 = vadd.f32 %v1509_v36, %v466_v44  ;;  %v978_v51 = vpop.f32.mrb[55].mxu1  ;;  %1039 = vmatprep.mubr.msk.bf16.mxu0 %vm1192_vm0, %v1191_v0  ;;  %1169 = vtanh.f32 %v464_v26 }
 0x1ff   :  { %1171 = vtanh.f32 %v467_v50  ;;  %v1166_v52 = vpop.eup %1165 }
 0x201   :  { %v1168_v54 = vpop.eup %1167 }
 0x202   :  { %v471_v55 = vpop.f32.mrb[56].mxu1  ;;  %v557_v56 = vpack.c.bf16 %v1168_v54, %v1166_v52 }
 0x203   :  { %v472_v57 = vadd.f32 %v1509_v36, %v471_v55  ;;  %v981_v58 = vpop.f32.mrb[57].mxu1 }
 0x204   :  { %v474_v59 = vpop.f32.mrb[58].mxu1  ;;  %1040 = vmatmul.mubr.bf16.gmra.mrb[52].mxu0 %v557_v56 }
 0x205   :  { %v475_v60 = vadd.f32 %v1509_v36, %v474_v59  ;;  %v982_v61 = vpop.f32.mrb[59].mxu1  ;;  %1043 = vmatprep.mubr.msk.bf16.mxu0 %vm1192_vm0, %v1191_v0  ;;  %1173 = vtanh.f32 %v472_v57 }
 0x207   :  { %1175 = vtanh.f32 %v475_v60  ;;  %v1170_v62 = vpop.eup %1169 }
 0x209   :  { %v1172_v63 = vpop.eup %1171 }
 0x20a   :  { %v479_v1 = vpop.f32.mrb[60].mxu1  ;;  %v558_v2 = vpack.c.bf16 %v1172_v63, %v1170_v62 }
 0x20b   :  { %v480_v3 = vadd.f32 %v1509_v36, %v479_v1  ;;  %v985_v4 = vpop.f32.mrb[61].mxu1 }
 0x20c   :  { %v482_v5 = vpop.f32.mrb[62].mxu1  ;;  %1044 = vmatmul.mubr.bf16.gmra.mrb[56].mxu0 %v558_v2 }
 0x20d   :  { %v483_v6 = vadd.f32 %v1509_v36, %v482_v5  ;;  %v986_v7 = vpop.f32.mrb[63].mxu1  ;;  %1047 = vmatprep.mubr.msk.bf16.mxu0 %vm1192_vm0, %v1191_v0  ;;  %1177 = vtanh.f32 %v480_v3 }
 0x20f   :  { %1179 = vtanh.f32 %v483_v6  ;;  %v1174_v8 = vpop.eup %1173 }
 0x211   :  { %v1176_v9 = vpop.eup %1175 }
 0x212   :  { %v487_v10 = vpop.f32.mrb[64].mxu1  ;;  %v559_v11 = vpack.c.bf16 %v1176_v9, %v1174_v8 }
 0x213   :  { %v488_v12 = vadd.f32 %v1509_v36, %v487_v10  ;;  %v989_v13 = vpop.f32.mrb[65].mxu1 }
 0x214   :  { %v490_v14 = vpop.f32.mrb[66].mxu1  ;;  %1048 = vmatmul.mubr.bf16.gmra.mrb[60].mxu0 %v559_v11 }
 0x215   :  { %v491_v15 = vadd.f32 %v1509_v36, %v490_v14  ;;  %v990_v16 = vpop.f32.mrb[67].mxu1  ;;  %1051 = vmatprep.mubr.msk.bf16.mxu0 %vm1192_vm0, %v1191_v0  ;;  %1181 = vtanh.f32 %v488_v12 }
 0x217   :  { %1183 = vtanh.f32 %v491_v15  ;;  %v1178_v17 = vpop.eup %1177 }
 0x219   :  { %v1180_v19 = vpop.eup %1179 }
 0x21a   :  { %v495_v21 = vpop.f32.mrb[68].mxu1  ;;  %v560_v22 = vpack.c.bf16 %v1180_v19, %v1178_v17 }
 0x21b   :  { %v496_v23 = vadd.f32 %v1509_v36, %v495_v21  ;;  %v993_v24 = vpop.f32.mrb[69].mxu1 }
 0x21c   :  { %v498_v25 = vpop.f32.mrb[70].mxu1  ;;  %1052 = vmatmul.mubr.bf16.gmra.mrb[64].mxu0 %v560_v22 }
 0x21d   :  { %v499_v27 = vadd.f32 %v1509_v36, %v498_v25  ;;  %v994_v28 = vpop.f32.mrb[71].mxu1  ;;  %1055 = vmatprep.mubr.msk.bf16.mxu0 %vm1192_vm0, %v1191_v0  ;;  %1185 = vtanh.f32 %v496_v23 }
 0x21f   :  { %1187 = vtanh.f32 %v499_v27  ;;  %v1182_v29 = vpop.eup %1181 }
 0x221   :  { %v1184_v30 = vpop.eup %1183 }
 0x222   :  { %v503_v31 = vpop.f32.mrb[72].mxu1  ;;  %v561_v32 = vpack.c.bf16 %v1184_v30, %v1182_v29 }
 0x223   :  { %v504_v33 = vadd.f32 %v1509_v36, %v503_v31  ;;  %v997_v34 = vpop.f32.mrb[73].mxu1  ;;  %v1563_v36 = vld [vmem:[%s1696_s6] ss:$0 sm:$0xff] }
 0x224   :  { %v506_v35 = vpop.f32.mrb[74].mxu1  ;;  %1056 = vmatmul.mubr.bf16.gmra.mrb[68].mxu0 %v561_v32 }
 0x225   :  { %1189 = vtanh.f32 %v504_v33  ;;  %v998_v37 = vpop.f32.mrb[75].mxu1  ;;  %1059 = vmatprep.mubr.msk.bf16.mxu0 %vm1192_vm0, %v1191_v0 }
 0x227   :  { %v1186_v39 = vpop.eup %1185 }
 0x229   :  { %v1188_v40 = vpop.eup %1187 }
 0x22a   :  { %v562_v41 = vpack.c.bf16 %v1188_v40, %v1186_v39 }
 0x22c   :  { %1060 = vmatmul.mubr.bf16.gmra.mrb[72].mxu0 %v562_v41 }
 0x22d   :  { %1063 = vmatprep.mubr.msk.bf16.mxu0 %vm1192_vm0, %v1191_v0 }
 0x22f   :  { %v1190_v42 = vpop.eup %1189 }
 0x230   :  { %v563_v43 = vpack.c.bf16 %v1190_v42, %v1190_v42 }
 0x234   :  { %1064 = vmatmul.mubr.bf16.gmra.mrb[76].mxu0 %v563_v43 }
 0x2a7   :  { %v652_v45 = vpop.f32.mrb[28].mxu0 }
 0x2a8   :  { %v653_v46 = vadd.f32 %v1563_v36, %v652_v45  ;;  %v1017_v47 = vpop.f32.mrb[29].mxu0 }
 0x2a9   :  { %v655_v48 = vpop.f32.mrb[30].mxu0 }
 0x2aa   :  { %755 = vst.msk [vmem:[%s1697_s7] sm:$0xff] %vm754_vm2, %v653_v46  ;;  %v656_v0 = vadd.f32 %v1563_v36, %v655_v48  ;;  %v1018_v49 = vpop.f32.mrb[31].mxu0 }
 0x2ac   :  { %756 = vst.msk [vmem:[%s1697_s7 + $0x8] sm:$0xff] %vm754_vm2, %v656_v0 }
 0x2af   :  { %v660_v53 = vpop.f32.mrb[32].mxu0 }
 0x2b0   :  { %v661_v18 = vadd.f32 %v1563_v36, %v660_v53  ;;  %v1021_v20 = vpop.f32.mrb[33].mxu0 }
 0x2b1   :  { %v663_v26 = vpop.f32.mrb[34].mxu0 }
 0x2b2   :  { %757 = vst.msk [vmem:[%s1697_s7 + $0x10] sm:$0xff] %vm754_vm2, %v661_v18  ;;  %v664_v38 = vadd.f32 %v1563_v36, %v663_v26  ;;  %v1022_v44 = vpop.f32.mrb[35].mxu0 }
 0x2b4   :  { %758 = vst.msk [vmem:[%s1697_s7 + $0x18] sm:$0xff] %vm754_vm2, %v664_v38 }
 0x2b7   :  { %v668_v50 = vpop.f32.mrb[36].mxu0 }
 0x2b8   :  { %v669_v51 = vadd.f32 %v1563_v36, %v668_v50  ;;  %v1025_v52 = vpop.f32.mrb[37].mxu0 }
 0x2b9   :  { %v671_v54 = vpop.f32.mrb[38].mxu0 }
 0x2ba   :  { %759 = vst.msk [vmem:[%s1697_s7 + $0x20] sm:$0xff] %vm754_vm2, %v669_v51  ;;  %v672_v55 = vadd.f32 %v1563_v36, %v671_v54  ;;  %v1026_v56 = vpop.f32.mrb[39].mxu0 }
 0x2bc   :  { %760 = vst.msk [vmem:[%s1697_s7 + $0x28] sm:$0xff] %vm754_vm2, %v672_v55 }
 0x2bf   :  { %v676_v57 = vpop.f32.mrb[40].mxu0 }
 0x2c0   :  { %v677_v58 = vadd.f32 %v1563_v36, %v676_v57  ;;  %v1029_v59 = vpop.f32.mrb[41].mxu0 }
 0x2c1   :  { %v679_v60 = vpop.f32.mrb[42].mxu0 }
 0x2c2   :  { %761 = vst.msk [vmem:[%s1697_s7 + $0x30] sm:$0xff] %vm754_vm2, %v677_v58  ;;  %v680_v61 = vadd.f32 %v1563_v36, %v679_v60  ;;  %v1030_v62 = vpop.f32.mrb[43].mxu0 }
 0x2c4   :  { %762 = vst.msk [vmem:[%s1697_s7 + $0x38] sm:$0xff] %vm754_vm2, %v680_v61 }
 0x2c7   :  { %v684_v63 = vpop.f32.mrb[44].mxu0 }
 0x2c8   :  { %v685_v1 = vadd.f32 %v1563_v36, %v684_v63  ;;  %v1033_v2 = vpop.f32.mrb[45].mxu0 }
 0x2c9   :  { %v687_v3 = vpop.f32.mrb[46].mxu0 }
 0x2ca   :  { %763 = vst.msk [vmem:[%s1697_s7 + $0x40] sm:$0xff] %vm754_vm2, %v685_v1  ;;  %v688_v4 = vadd.f32 %v1563_v36, %v687_v3  ;;  %v1034_v5 = vpop.f32.mrb[47].mxu0 }
 0x2cc   :  { %764 = vst.msk [vmem:[%s1697_s7 + $0x48] sm:$0xff] %vm754_vm2, %v688_v4 }
 0x2cf   :  { %v692_v6 = vpop.f32.mrb[48].mxu0 }
 0x2d0   :  { %v693_v7 = vadd.f32 %v1563_v36, %v692_v6  ;;  %v1037_v8 = vpop.f32.mrb[49].mxu0 }
 0x2d1   :  { %v695_v9 = vpop.f32.mrb[50].mxu0 }
 0x2d2   :  { %765 = vst.msk [vmem:[%s1697_s7 + $0x50] sm:$0xff] %vm754_vm2, %v693_v7  ;;  %v696_v10 = vadd.f32 %v1563_v36, %v695_v9  ;;  %v1038_v11 = vpop.f32.mrb[51].mxu0 }
 0x2d4   :  { %766 = vst.msk [vmem:[%s1697_s7 + $0x58] sm:$0xff] %vm754_vm2, %v696_v10 }
 0x2d7   :  { %v700_v12 = vpop.f32.mrb[52].mxu0 }
 0x2d8   :  { %v701_v13 = vadd.f32 %v1563_v36, %v700_v12  ;;  %v1041_v14 = vpop.f32.mrb[53].mxu0 }
 0x2d9   :  { %v703_v15 = vpop.f32.mrb[54].mxu0 }
 0x2da   :  { %767 = vst.msk [vmem:[%s1697_s7 + $0x60] sm:$0xff] %vm754_vm2, %v701_v13  ;;  %v704_v16 = vadd.f32 %v1563_v36, %v703_v15  ;;  %v1042_v17 = vpop.f32.mrb[55].mxu0 }
 0x2dc   :  { %768 = vst.msk [vmem:[%s1697_s7 + $0x68] sm:$0xff] %vm754_vm2, %v704_v16 }
 0x2df   :  { %v708_v19 = vpop.f32.mrb[56].mxu0 }
 0x2e0   :  { %v709_v21 = vadd.f32 %v1563_v36, %v708_v19  ;;  %v1045_v22 = vpop.f32.mrb[57].mxu0 }
 0x2e1   :  { %v711_v23 = vpop.f32.mrb[58].mxu0 }
 0x2e2   :  { %769 = vst.msk [vmem:[%s1697_s7 + $0x70] sm:$0xff] %vm754_vm2, %v709_v21  ;;  %v712_v24 = vadd.f32 %v1563_v36, %v711_v23  ;;  %v1046_v25 = vpop.f32.mrb[59].mxu0 }
 0x2e4   :  { %770 = vst.msk [vmem:[%s1697_s7 + $0x78] sm:$0xff] %vm754_vm2, %v712_v24 }
 0x2e7   :  { %v716_v27 = vpop.f32.mrb[60].mxu0 }
 0x2e8   :  { %v717_v28 = vadd.f32 %v1563_v36, %v716_v27  ;;  %v1049_v29 = vpop.f32.mrb[61].mxu0 }
 0x2e9   :  { %v719_v30 = vpop.f32.mrb[62].mxu0 }
 0x2ea   :  { %771 = vst.msk [vmem:[%s1697_s7 + $0x80] sm:$0xff] %vm754_vm2, %v717_v28  ;;  %v720_v31 = vadd.f32 %v1563_v36, %v719_v30  ;;  %v1050_v32 = vpop.f32.mrb[63].mxu0 }
 0x2ec   :  { %772 = vst.msk [vmem:[%s1697_s7 + $0x88] sm:$0xff] %vm754_vm2, %v720_v31 }
 0x2ef   :  { %v724_v33 = vpop.f32.mrb[64].mxu0 }
 0x2f0   :  { %v725_v34 = vadd.f32 %v1563_v36, %v724_v33  ;;  %v1053_v35 = vpop.f32.mrb[65].mxu0 }
 0x2f1   :  { %v727_v37 = vpop.f32.mrb[66].mxu0 }
 0x2f2   :  { %773 = vst.msk [vmem:[%s1697_s7 + $0x90] sm:$0xff] %vm754_vm2, %v725_v34  ;;  %v728_v39 = vadd.f32 %v1563_v36, %v727_v37  ;;  %v1054_v40 = vpop.f32.mrb[67].mxu0 }
 0x2f4   :  { %774 = vst.msk [vmem:[%s1697_s7 + $0x98] sm:$0xff] %vm754_vm2, %v728_v39 }
 0x2f7   :  { %v732_v41 = vpop.f32.mrb[68].mxu0 }
 0x2f8   :  { %v733_v42 = vadd.f32 %v1563_v36, %v732_v41  ;;  %v1057_v43 = vpop.f32.mrb[69].mxu0 }
 0x2f9   :  { %v735_v45 = vpop.f32.mrb[70].mxu0 }
 0x2fa   :  { %775 = vst.msk [vmem:[%s1697_s7 + $0xa0] sm:$0xff] %vm754_vm2, %v733_v42  ;;  %v736_v46 = vadd.f32 %v1563_v36, %v735_v45  ;;  %v1058_v47 = vpop.f32.mrb[71].mxu0 }
 0x2fc   :  { %776 = vst.msk [vmem:[%s1697_s7 + $0xa8] sm:$0xff] %vm754_vm2, %v736_v46 }
 0x2ff   :  { %v740_v48 = vpop.f32.mrb[72].mxu0 }
 0x300   :  { %v741_v0 = vadd.f32 %v1563_v36, %v740_v48  ;;  %v1061_v49 = vpop.f32.mrb[73].mxu0 }
 0x301   :  { %v743_v53 = vpop.f32.mrb[74].mxu0 }
 0x302   :  { %777 = vst.msk [vmem:[%s1697_s7 + $0xb0] sm:$0xff] %vm754_vm2, %v741_v0  ;;  %v744_v18 = vadd.f32 %v1563_v36, %v743_v53  ;;  %v1062_v20 = vpop.f32.mrb[75].mxu0 }
 0x304   :  { %778 = vst.msk [vmem:[%s1697_s7 + $0xb8] sm:$0xff] %vm754_vm2, %v744_v18 }
 0x307   :  { %v748_v26 = vpop.f32.mrb[76].mxu0 }
 0x308   :  { %v749_v38 = vadd.f32 %v1563_v36, %v748_v26  ;;  %v1065_v44 = vpop.f32.mrb[77].mxu0 }
 0x309   :  { %v751_v50 = vpop.f32.mrb[78].mxu0 }
 0x30a   :  { %779 = vst.msk [vmem:[%s1697_s7 + $0xc0] sm:$0xff] %vm754_vm2, %v749_v38  ;;  %v1066_v51 = vpop.f32.mrb[79].mxu0 }

</bundles_post_ra>
